<compile_context>
chip_gen: v7x
topology: tpu7x:2x2x1
jax: 0.10.0
libtpu: 0.0.40
codegen_flags: <defaults>
</compile_context>

<pallas_src>
import functools
import math

import jax
import jax.numpy as jnp
from jax.experimental import pallas as pl
from jax.experimental.pallas import tpu as pltpu


_MAX_TILE_M = 256                      # cap sized for v7x's 64 MiB VMEM (see review)
_VMEM_LIMIT = 32 * 1024 * 1024         # explicit scoped-VMEM budget, safe on v5e/v6e/v7x


# =========================================================================
# Small helpers
# =========================================================================

def _round_up(x, m):
    return (x + m - 1) // m * m


def _pad_rows(x2, m_pad):
    m = x2.shape[0]
    if m_pad == m:
        return x2
    return jnp.pad(x2, ((0, m_pad - m), (0, 0)))


def _layernorm_f32(x, g, b):
    """torch LayerNorm (biased variance, eps=1e-5) in fp32, matching the fp16-handling
    LayerNorm subclass semantics."""
    x = x.astype(jnp.float32)
    mu = jnp.mean(x, axis=-1, keepdims=True)
    xc = x - mu
    var = jnp.mean(xc * xc, axis=-1, keepdims=True)
    return (xc * jax.lax.rsqrt(var + 1e-5)) * g + b


def _row_tiled_call(kernel, row_inputs, rep_inputs, out_cols,
                    out_dtype=jnp.float32):
    """Run `kernel` over M-row tiles with a 1-D 'parallel' grid.

    row_inputs: list of (M, Ki) arrays tiled along rows (padded to a tile multiple).
    rep_inputs: arrays passed whole to every grid step (weights / LN params / biases).
    Kernel signature: kernel(*row_refs, *rep_refs, o_ref), o block = (tile, out_cols).
    """
    M = row_inputs[0].shape[0]
    tile = min(_MAX_TILE_M, _round_up(M, 8))
    m_pad = _round_up(M, tile)
    padded = [_pad_rows(a, m_pad) for a in row_inputs]
    in_specs = (
        [pl.BlockSpec((tile, a.shape[1]), lambda i: (i, 0)) for a in padded]
        + [pl.BlockSpec(a.shape, lambda i, nd=a.ndim: (0,) * nd) for a in rep_inputs])
    out = pl.pallas_call(
        kernel,
        grid=(m_pad // tile,),
        in_specs=in_specs,
        out_specs=pl.BlockSpec((tile, out_cols), lambda i: (i, 0)),
        out_shape=jax.ShapeDtypeStruct((m_pad, out_cols), out_dtype),
        compiler_params=pltpu.CompilerParams(
            dimension_semantics=("parallel",),
            vmem_limit_bytes=_VMEM_LIMIT),
    )(*padded, *rep_inputs)
    return out[:M]


# =========================================================================
# Pallas kernels
# =========================================================================

def _matmul_kernel(x_ref, w_ref, o_ref):
    o_ref[...] = jnp.dot(x_ref[...].astype(jnp.bfloat16), w_ref[...],
                         preferred_element_type=jnp.float32).astype(o_ref.dtype)


def _layernorm_kernel(x_ref, g_ref, b_ref, o_ref):
    o_ref[...] = _layernorm_f32(x_ref[...], g_ref[...], b_ref[...])


def _ln_linear_kernel(x_ref, g_ref, b_ref, w_ref, bias_ref, o_ref):
    """y = LN(x) @ W + b  (LN in fp32, dot in bf16 with fp32 accumulate)."""
    y = _layernorm_f32(x_ref[...], g_ref[...], b_ref[...])
    o_ref[...] = (jnp.dot(y.astype(jnp.bfloat16), w_ref[...],
                          preferred_element_type=jnp.float32)
                  + bias_ref[...]).astype(o_ref.dtype)


def _linear_residual_kernel(x_ref, res_ref, w_ref, bias_ref, o_ref):
    """o = res + x @ W + b  (residual add fused into the projection epilogue)."""
    o_ref[...] = (res_ref[...].astype(jnp.float32)
                  + jnp.dot(x_ref[...].astype(jnp.bfloat16), w_ref[...],
                            preferred_element_type=jnp.float32)
                  + bias_ref[...])


def _ln_mlp_residual_kernel(x_ref, g_ref, b_ref, w1_ref, b1_ref, w2_ref, b2_ref,
                            o_ref):
    """o = x + c_proj(QuickGELU(c_fc(LN(x))))  — full MLP block fused."""
    x = x_ref[...].astype(jnp.float32)
    y = _layernorm_f32(x, g_ref[...], b_ref[...])
    h = jnp.dot(y.astype(jnp.bfloat16), w1_ref[...],
                preferred_element_type=jnp.float32) + b1_ref[...]
    h = h * jax.nn.sigmoid(1.702 * h)                      # QuickGELU (EUP sigmoid)
    o_ref[...] = x + (jnp.dot(h.astype(jnp.bfloat16), w2_ref[...],
                              preferred_element_type=jnp.float32) + b2_ref[...])


def _softmax_attend(q, k, v, scale):
    """All heads of one batch element: q,k,v (H, N, hd) bf16 -> (H, N, hd) fp32."""
    s = jnp.einsum('hqd,hkd->hqk', q, k,
                   preferred_element_type=jnp.float32) * scale
    s = s - jnp.max(s, axis=-1, keepdims=True)
    p = jnp.exp(s)
    p = p * pl.reciprocal(jnp.sum(p, axis=-1, keepdims=True), approx=True)
    return jnp.einsum('hqk,hkd->hqd', p.astype(jnp.bfloat16), v,
                      preferred_element_type=jnp.float32)


def _sdpa_kernel(q_ref, k_ref, v_ref, o_ref, *, scale):
    q = q_ref[0].astype(jnp.bfloat16)
    k = k_ref[0].astype(jnp.bfloat16)
    v = v_ref[0].astype(jnp.bfloat16)
    o_ref[0] = _softmax_attend(q, k, v, scale).astype(o_ref.dtype)


def _vv_sdpa_kernel(q_ref, k_ref, v_ref, o_vv_ref, o_ori_ref, *, scale):
    """Both VVAttention variants in one kernel: softmax(qk^T)v and softmax(vv^T)v,
    with q/k/v resident in VMEM (no second DMA of v)."""
    q = q_ref[0].astype(jnp.bfloat16)
    k = k_ref[0].astype(jnp.bfloat16)
    v = v_ref[0].astype(jnp.bfloat16)
    o_ori_ref[0] = _softmax_attend(q, k, v, scale).astype(o_ori_ref.dtype)
    o_vv_ref[0] = _softmax_attend(v, v, v, scale).astype(o_vv_ref.dtype)


# =========================================================================
# Pallas wrappers
# =========================================================================

def pallas_matmul(x2, w_bf16, out_dtype=jnp.float32):
    """(M, K) @ (K, N) bf16 weight -> (M, N), M-tiled."""
    return _row_tiled_call(_matmul_kernel, [x2], [w_bf16], w_bf16.shape[1],
                           out_dtype)


def pallas_layernorm(x, gamma, beta):
    shp = x.shape
    x2 = x.reshape(-1, shp[-1])
    out = _row_tiled_call(_layernorm_kernel, [x2],
                          [gamma.reshape(1, -1), beta.reshape(1, -1)], shp[-1])
    return out.reshape(shp)


def pallas_ln_linear(x2, g, b, w_bf16, bias, out_dtype=jnp.float32):
    return _row_tiled_call(_ln_linear_kernel, [x2],
                           [g.reshape(1, -1), b.reshape(1, -1), w_bf16,
                            bias.reshape(1, -1)],
                           w_bf16.shape[1], out_dtype)


def pallas_linear_residual(x2, res2, w_bf16, bias):
    return _row_tiled_call(_linear_residual_kernel, [x2, res2],
                           [w_bf16, bias.reshape(1, -1)], w_bf16.shape[1])


def pallas_ln_mlp_residual(x2, g, b, w1_bf16, b1, w2_bf16, b2):
    return _row_tiled_call(_ln_mlp_residual_kernel, [x2],
                           [g.reshape(1, -1), b.reshape(1, -1),
                            w1_bf16, b1.reshape(1, -1),
                            w2_bf16, b2.reshape(1, -1)],
                           w2_bf16.shape[1])


def pallas_sdpa(q, k, v, scale):
    """q,k,v: (B, H, N, hd) — one grid step processes all heads of one batch."""
    B, H, N, hd = q.shape
    spec = pl.BlockSpec((1, H, N, hd), lambda b: (b, 0, 0, 0))
    return pl.pallas_call(
        functools.partial(_sdpa_kernel, scale=scale),
        grid=(B,),
        in_specs=[spec, spec, spec],
        out_specs=spec,
        out_shape=jax.ShapeDtypeStruct((B, H, N, hd), jnp.bfloat16),
        compiler_params=pltpu.CompilerParams(
            dimension_semantics=("parallel",),
            vmem_limit_bytes=_VMEM_LIMIT),
    )(q, k, v)


def pallas_vv_sdpa(q, k, v, scale):
    """Returns (o_vv, o_ori), each (B, H, N, hd) bf16."""
    B, H, N, hd = q.shape
    spec = pl.BlockSpec((1, H, N, hd), lambda b: (b, 0, 0, 0))
    o_sds = jax.ShapeDtypeStruct((B, H, N, hd), jnp.bfloat16)
    return pl.pallas_call(
        functools.partial(_vv_sdpa_kernel, scale=scale),
        grid=(B,),
        in_specs=[spec, spec, spec],
        out_specs=[spec, spec],
        out_shape=[o_sds, o_sds],
        compiler_params=pltpu.CompilerParams(
            dimension_semantics=("parallel",),
            vmem_limit_bytes=_VMEM_LIMIT),
    )(q, k, v)


# =========================================================================
# Model pieces (plain-JAX glue around the Pallas kernels)
# =========================================================================

def mha_block(x, blk, num_heads):
    """Standard residual block (nn.MultiheadAttention path). x: (S, B, D)."""
    S, B, D = x.shape
    hd = D // num_heads
    M = S * B
    x2 = x.reshape(M, D)

    qkv = pallas_ln_linear(x2, blk['ln1_g'], blk['ln1_b'],
                           blk['attn_in_w_t'], blk['attn_in_b'],
                           out_dtype=jnp.bfloat16)               # (M, 3D) bf16
    qkv = qkv.reshape(S, B, 3, num_heads, hd)
    q = qkv[:, :, 0].transpose(1, 2, 0, 3)                        # (B, H, S, hd)
    k = qkv[:, :, 1].transpose(1, 2, 0, 3)
    v = qkv[:, :, 2].transpose(1, 2, 0, 3)

    o = pallas_sdpa(q, k, v, 1.0 / math.sqrt(hd))                 # (B, H, S, hd)
    o2 = o.transpose(2, 0, 1, 3).reshape(M, D)                    # (S*B, D)

    x2 = pallas_linear_residual(o2, x2, blk['attn_out_w_t'], blk['attn_out_b'])
    x2 = pallas_ln_mlp_residual(x2, blk['ln2_g'], blk['ln2_b'],
                                blk['mlp_fc_w_t'], blk['mlp_fc_b'],
                                blk['mlp_proj_w_t'], blk['mlp_proj_b'])
    return x2.reshape(S, B, D)


def vv_block(x_cur, x_ori, blk, num_heads, ffn):
    """VVAttention residual block (post DAPM_replace). x_cur may be None when the
    incoming state is not yet a list. Returns (x_cur_new, x_ori_new), (S, B, D)."""
    S, B, D = x_ori.shape
    hd = D // num_heads
    M = S * B
    x_ori2 = x_ori.reshape(M, D)

    qkv = pallas_ln_linear(x_ori2, blk['ln1_g'], blk['ln1_b'],
                           blk['attn_in_w_t'], blk['attn_in_b'],
                           out_dtype=jnp.bfloat16)                # LN1 fused with QKV
    qkv = qkv.reshape(S, B, 3, num_heads, hd)
    q = qkv[:, :, 0].transpose(1, 2, 0, 3)                        # (B, H, N, hd)
    k = qkv[:, :, 1].transpose(1, 2, 0, 3)
    v = qkv[:, :, 2].transpose(1, 2, 0, 3)

    o_vv, o_ori = pallas_vv_sdpa(q, k, v, hd ** -0.5)

    def back(t):                                                  # (B,H,N,hd)->(N*B, D)
        return t.transpose(2, 0, 1, 3).reshape(M, D)

    # Stack both attention outputs along M for a single shared out-projection call,
    # with the correct residual fused per half.
    attn_stack = jnp.concatenate([back(o_vv), back(o_ori)], axis=0)   # (2M, D)
    if x_cur is None:
        res_vv = x_ori2           # non-list branch: both residuals are x
    elif ffn:
        res_vv = x_ori2           # ffn branch: x = x_res + x_ori_1
    else:
        res_vv = x_cur.reshape(M, D)
    res_stack = jnp.concatenate([res_vv, x_ori2], axis=0)

    proj = pallas_linear_residual(attn_stack, res_stack,
                                  blk['attn_out_w_t'], blk['attn_out_b'])
    x_cur_mid, x_ori_mid = proj[:M], proj[M:]

    x_ori_new = pallas_ln_mlp_residual(x_ori_mid, blk['ln2_g'], blk['ln2_b'],
                                       blk['mlp_fc_w_t'], blk['mlp_fc_b'],
                                       blk['mlp_proj_w_t'], blk['mlp_proj_b'])
    if ffn and x_cur is not None:
        # reference: x = x_res + x_ori_1 (the earlier `x += x_res` is overwritten),
        # then x = x + mlp(ln2(x))
        x_cur_new = pallas_ln_mlp_residual(x_cur_mid, blk['ln2_g'], blk['ln2_b'],
                                           blk['mlp_fc_w_t'], blk['mlp_fc_b'],
                                           blk['mlp_proj_w_t'], blk['mlp_proj_b'])
    else:
        x_cur_new = x_cur_mid
    return x_cur_new.reshape(S, B, D), x_ori_new.reshape(S, B, D)


def resblock_maple(inputs, blk, num_heads, nctx, first_layer, ffn=False):
    """ResidualAttentionBlock_MaPLe.forward."""
    x, prompts, counter = inputs

    # MaPLe compound-prompt injection (pure concatenation glue).
    if (not first_layer) and len(prompts) > 0 and counter <= len(prompts) - 1:
        if counter == 0:
            prefix = x
        elif isinstance(x, list):
            prefix = [v[0:v.shape[0] - nctx] for v in x]
        else:
            prefix = x[0:x.shape[0] - nctx]
        vc = prompts[counter]                                     # (nctx, D)
        bs = x[0].shape[1] if isinstance(x, list) else x.shape[1]
        vc = jnp.broadcast_to(vc[None], (bs,) + vc.shape).transpose(1, 0, 2)
        # TODO(synk): reference casts visual_context to fp16 (.half()); kept fp32 here.
        if isinstance(x, list):
            x = [jnp.concatenate([v, vc], axis=0) for v in prefix]
        else:
            x = jnp.concatenate([prefix, vc], axis=0)
        counter = counter + 1

    if blk['is_vv']:
        if isinstance(x, list):
            x_cur, x_ori = x
            x_cur_new, x_ori_new = vv_block(x_cur, x_ori, blk, num_heads, ffn)
        else:
            x_cur_new, x_ori_new = vv_block(None, x, blk, num_heads, ffn)
        return [[x_cur_new, x_ori_new], prompts, counter]
    else:
        x = mha_block(x, blk, num_heads)
        return [x, prompts, counter]


def vision_transformer_maple_forward(params, x_img, features_list,
                                     ffn=False, compound_deeper_prompts=()):
    """VisionTransformer_MaPLe.forward (DPAM_layer applied, maple=True path)."""
    cfg = params['cfg']
    width, heads = cfg['width'], cfg['heads']
    psz, nctx = cfg['patch_size'], cfg['nctx']

    B, Cin, H, W = x_img.shape
    Hp, Wp = H // psz, W // psz

    # conv1 (kernel == stride == patch_size, no bias) == patch reshape + matmul.
    patches = x_img.reshape(B, Cin, Hp, psz, Wp, psz)
    patches = patches.transpose(0, 2, 4, 1, 3, 5).reshape(B * Hp * Wp,
                                                          Cin * psz * psz)
    x = pallas_matmul(patches, params['conv1_w_t']).reshape(B, Hp * Wp, width)

    cls = jnp.broadcast_to(params['class_embedding'][None, None, :], (B, 1, width))
    x = jnp.concatenate([cls, x], axis=1)                          # (B, N+1, width)
    # TODO(synk): bilinear positional-embedding resize branch (side != new_side)
    # not implemented; shapes here keep side == new_side so the branch is skipped.
    x = x + params['positional_embedding'][None]
    x = pallas_layernorm(x, params['ln_pre_g'], params['ln_pre_b'])
    x = x.transpose(1, 0, 2)                                       # (seq, B, width)

    # Transformer.AnomalyCLIP_MAPLE_forward
    state = [x, list(compound_deeper_prompts), 0]
    out_tokens = []
    for i, blk in enumerate(params['blocks']):
        state = resblock_maple(state, blk, heads, nctx,
                               first_layer=(i == 0), ffn=ffn)
        if (i + 1) in features_list:
            xcur = state[0]
            out_tokens.append(xcur[0] if isinstance(xcur, list) else xcur)

    x_cur, x_ori = state[0]

    # ln_post + @proj fused (zero bias).
    out_dim = params['proj_w'].shape[1]
    zero_bias = jnp.zeros((out_dim,), jnp.float32)
    patch_token_list = []
    for pt in out_tokens:
        ptb = pt.transpose(1, 0, 2)                                # (B, S, width)
        Bp, Sp, _ = ptb.shape
        proj = pallas_ln_linear(ptb.reshape(Bp * Sp, width),
                                params['ln_post_g'], params['ln_post_b'],
                                params['proj_w'], zero_bias)
        patch_token_list.append(proj.reshape(Bp, Sp, -1))

    cls_out = pallas_matmul(x_ori[0], params['proj_w'])            # (B, output_dim)
    return cls_out, patch_token_list


# =========================================================================
# Deterministic synthetic parameter initialization
# =========================================================================

def init_params(key, *, input_resolution, patch_size, width, layers, heads,
                output_dim, nctx, dpam_layer):
    scale = width ** -0.5
    num_patches = (input_resolution // patch_size) ** 2
    keys = iter(jax.random.split(key, 16 + layers * 12))

    def nrm(shape, s=0.02):
        return s * jax.random.normal(next(keys), shape, dtype=jnp.float32)

    # Weights are generated in torch layout, then transposed ONCE here into the (K, N)
    # layout the kernels consume and cast to bf16 (hoisted out of the forward pass).
    conv1_w = nrm((width, 3, patch_size, patch_size))
    params = {
        'cfg': dict(width=width, heads=heads, patch_size=patch_size, nctx=nctx),
        'conv1_w_t': conv1_w.reshape(width, -1).T.astype(jnp.bfloat16),
        'class_embedding': nrm((width,), scale),
        'positional_embedding': nrm((num_patches + 1, width), scale),
        'ln_pre_g': jnp.ones((width,), jnp.float32),
        'ln_pre_b': jnp.zeros((width,), jnp.float32),
        'ln_post_g': jnp.ones((width,), jnp.float32),
        'ln_post_b': jnp.zeros((width,), jnp.float32),
        'proj_w': nrm((width, output_dim), scale).astype(jnp.bfloat16),
        'blocks': [],
    }
    for i in range(layers):
        attn_in_w = nrm((3 * width, width))       # torch in_proj_weight layout
        attn_out_w = nrm((width, width))
        mlp_fc_w = nrm((4 * width, width))
        mlp_proj_w = nrm((width, 4 * width))
        params['blocks'].append({
            # DAPM_replace(dpam_layer) replaces the last (dpam_layer-1) blocks'
            # attention with VVAttention (weights shared with the original MHA).
            'is_vv': i >= layers - (dpam_layer - 1),
            'attn_in_w_t': attn_in_w.T.astype(jnp.bfloat16),     # (D, 3D)
            'attn_in_b': nrm((3 * width,)),
            'attn_out_w_t': attn_out_w.T.astype(jnp.bfloat16),   # (D, D)
            'attn_out_b': nrm((width,)),
            'ln1_g': jnp.ones((width,), jnp.float32),
            'ln1_b': jnp.zeros((width,), jnp.float32),
            'ln2_g': jnp.ones((width,), jnp.float32),
            'ln2_b': jnp.zeros((width,), jnp.float32),
            'mlp_fc_w_t': mlp_fc_w.T.astype(jnp.bfloat16),       # (D, 4D)
            'mlp_fc_b': nrm((4 * width,)),
            'mlp_proj_w_t': mlp_proj_w.T.astype(jnp.bfloat16),   # (4D, D)
            'mlp_proj_b': nrm((width,)),
        })
    return params


# =========================================================================
# Main
# =========================================================================

if __name__ == "__main__":
    # Small shapes consistent with the module:
    #   image (B=2, C=3, 16, 16), patch 8 -> 4 patches + CLS = 5 tokens,
    #   width 32, 4 heads, 3 layers, output_dim 16, DPAM on last block,
    #   one compound deep prompt of length nctx=2 (MaPLe injection at layer 1).
    input_resolution, patch_size = 16, 8
    width, layers, heads, output_dim = 32, 3, 4, 16
    nctx, dpam_layer = 2, 2
    features_list = [2, 3]

    key = jax.random.PRNGKey(0)
    k_par, k_img, k_prm = jax.random.split(key, 3)

    params = init_params(k_par, input_resolution=input_resolution,
                         patch_size=patch_size, width=width, layers=layers,
                         heads=heads, output_dim=output_dim, nctx=nctx,
                         dpam_layer=dpam_layer)

    x_img = jax.random.normal(k_img, (2, 3, input_resolution, input_resolution),
                              dtype=jnp.float32)
    compound_prompts = [0.02 * jax.random.normal(k_prm, (nctx, width),
                                                 dtype=jnp.float32)]

    cls_out, patch_tokens = vision_transformer_maple_forward(
        params, x_img, features_list, ffn=False,
        compound_deeper_prompts=compound_prompts)

    jax.block_until_ready(cls_out)
    for pt in patch_tokens:
        jax.block_until_ready(pt)

    assert cls_out.shape == (2, output_dim)
    assert len(patch_tokens) == len(features_list)
    print("KERNEL_OK")
</pallas_src>

<mosaic_0001>
module attributes {stable_mosaic.version = 11 : i64} {
  func.func @_matmul_kernel(%arg0: i32, %arg1: memref<8x192xf32, #tpu.memory_space<vmem>>, %arg2: memref<192x32xbf16, #tpu.memory_space<vmem>>, %arg3: memref<8x32xf32, #tpu.memory_space<vmem>>) attributes {dimension_semantics = [#tpu.dimension_semantics<parallel>], iteration_bounds = array<i64: 1>, scalar_prefetch = 0 : i64, scratch_operands = 0 : i64, tpu.core_type = #tpu.core_type<tc>, window_params = [{transform_indices = @transform_0, window_bounds = array<i64: 8, 192>}, {pipeline_mode = #tpu.pipeline_mode<synchronous>, transform_indices = @transform_1, window_bounds = array<i64: 192, 32>}, {transform_indices = @transform_2, window_bounds = array<i64: 8, 32>}]} {
    %c0 = arith.constant 0 : index
    %c0_0 = arith.constant 0 : index
    %0 = vector.load %arg1[%c0, %c0_0] : memref<8x192xf32, #tpu.memory_space<vmem>>, vector<8x192xf32>
    %1 = arith.truncf %0 : vector<8x192xf32> to vector<8x192xbf16>
    %c0_1 = arith.constant 0 : index
    %c0_2 = arith.constant 0 : index
    %2 = vector.load %arg2[%c0_1, %c0_2] : memref<192x32xbf16, #tpu.memory_space<vmem>>, vector<192x32xbf16>
    %cst = arith.constant dense<0.000000e+00> : vector<8x32xf32>
    %3 = tpu.matmul %1, %2, %cst {dimension_numbers = #tpu.dot_dimension_numbers<[1], [0], [0], [1], [0, 0, 1, 1], [], []>} : vector<8x192xbf16>, vector<192x32xbf16>, vector<8x32xf32> -> vector<8x32xf32>
    %c0_3 = arith.constant 0 : index
    %c0_4 = arith.constant 0 : index
    %4 = vector.load %arg3[%c0_3, %c0_4] : memref<8x32xf32, #tpu.memory_space<vmem>>, vector<8x32xf32>
    tpu.vector_store %arg3[%c0_3, %c0_4], %3 {strides = array<i32>} : memref<8x32xf32, #tpu.memory_space<vmem>>, vector<8x32xf32>,
    return
  }
  func.func @transform_0(%arg0: i32) -> (i32, i32) {
    %c0_i32 = arith.constant 0 : i32
    %c0_i32_0 = arith.constant 0 : i32
    return %arg0, %c0_i32 : i32, i32
  }
  func.func @transform_1(%arg0: i32) -> (i32, i32) {
    %c0_i32 = arith.constant 0 : i32
    %c0_i32_0 = arith.constant 0 : i32
    %c0_i32_1 = arith.constant 0 : i32
    return %c0_i32, %c0_i32_0 : i32, i32
  }
  func.func @transform_2(%arg0: i32) -> (i32, i32) {
    %c0_i32 = arith.constant 0 : i32
    %c0_i32_0 = arith.constant 0 : i32
    return %arg0, %c0_i32 : i32, i32
  }
}

</mosaic_0001>

<bundles_post_ra>
// kernel: tpu_custom_call.1
= control target key start
LH: loop header
LB: loop body
LE: loop exit
PB: predicated region body
PF: predicated region fallthrough
CT: control target
= control target key end

     0   :  { %v224_v1 = vmov 0   ;;  %vm113_vm0 = vcmask 523264   ;;  %s295_s0 = inlined_call_operand.vmem [shape: f32[8,192], index: 0, kind: input, shape index: {}]   ;;  %s296_s1 = inlined_call_operand.vmem [shape: bf16[192,32], index: 1, kind: input, shape index: {}]   ;;  %s297_s2 = inlined_call_operand.hbm [shape: f32[8,32], index: 2, kind: output, shape index: {}]  }
   0x1   :  { %v188_v0 = vld [vmem:[%s296_s1] sm:$0xff]   ;;  %117 = vmatprep.subr.bf16.mxu0 %v224_v1  ;;  %v189_v2 = vld [vmem:[%s296_s1 + $0x8] sm:$0xff]   ;;  %v190_v3 = vld [vmem:[%s296_s1 + $0x10] sm:$0xff]  }
   0x2   :  { %118 = vmatpush1.bf16.msra.mxu0 %v188_v0  ;;  %v191_v4 = vld [vmem:[%s296_s1 + $0x18] sm:$0xff]   ;;  %v14_v5 = vld [vmem:[%s295_s0 + $0x8] sm:$0xff] }
   0x3   :  { %119 = vmatprep.subr.bf16.mxu0 %v224_v1 }
   0x6   :  { %120 = vmatpush1.bf16.msra.mxu0 %v189_v2 }
   0x7   :  { %121 = vmatprep.subr.bf16.mxu0 %v224_v1 }
   0xa   :  { %122 = vmatpush1.bf16.msra.mxu0 %v190_v3 }
   0xb   :  { %123 = vmatprep.subr.bf16.mxu0 %v224_v1 }
   0xc   :  { %7 = vsyncpa [#allocation3], 0  ;;  %v16_v6 = vpack.c.bf16 %v14_v5, %v14_v5  ;;  %v192_v7 = vld [vmem:[%s296_s1 + $0x20] sm:$0xff]   ;;  %v193_v8 = vld [vmem:[%s296_s1 + $0x28] sm:$0xff]   ;;  %s225_s9 = smov [#allocation2]   ;;  %vm157_vm1 = vcmask 261120  }
   0xd   :  { %v194_v9 = vld [vmem:[%s296_s1 + $0x30] sm:$0xff]   ;;  %v195_v10 = vld [vmem:[%s296_s1 + $0x38] sm:$0xff]   ;;  %v196_v11 = vld [vmem:[%s296_s1 + $0x40] sm:$0xff]   ;;  %s165_s10 = sshll.u32 %s225_s9, 4  ;;  %s166_s10 = int_to_ptr.vmem [resolvable:$true] %s165_s10 }
   0xe   :  { %124 = vmatpush1.bf16.msra.mxu0 %v191_v4  ;;  %185 = vmatprep.mubr.msk.bf16.mxu0 %vm113_vm0, %v16_v6  ;;  %v197_v12 = vld [vmem:[%s296_s1 + $0x48] sm:$0xff]   ;;  %v198_v13 = vld [vmem:[%s296_s1 + $0x50] sm:$0xff]   ;;  %v199_v14 = vld [vmem:[%s296_s1 + $0x58] sm:$0xff]   ;;  %s200_s11 = scalar_lea.vmem %s166_s10, 128  ;;  %p205_p1 = scmp.lt.s32.totalorder %s166_s10, %s166_s10 }
   0xf   :  { %125 = vmatprep.subr.bf16.mxu0 %v224_v1  ;;  %v13_v15 = vld [vmem:[%s295_s0] sm:$0xff]  ;;  %p201_p0 = scmp.ne.s32.totalorder %s166_s10, %s200_s11  ;;  %p206_p2 = scmp.lt.s32.totalorder %s200_s11, %s200_s11 }
  0x10   :  { %v15_v16 = vpack.c.bf16 %v13_v15, %v13_v15 }
  0x11   :  { %p207_p3 = por %p206_p2, %p205_p1 }
  0x12   :  { %126 = vmatpush1.bf16.msra.mxu0 %v192_v7 }
  0x13   :  { %127 = vmatprep.subr.bf16.mxu0 %v224_v1  ;;  %p208_p4 = pnand %p207_p3, %p201_p0 }
  0x16   :  { %128 = vmatpush1.bf16.msra.mxu0 %v193_v8 }
  0x17   :  { %129 = vmatprep.subr.bf16.mxu0 %v224_v1 }
  0x1a   :  { %130 = vmatpush1.bf16.msra.mxu0 %v194_v9 }
  0x1b   :  { %131 = vmatprep.subr.bf16.mxu0 %v224_v1 }
  0x1e   :  { %132 = vmatpush1.bf16.msra.mxu0 %v195_v10 }
  0x1f   :  { %133 = vmatprep.subr.bf16.mxu0 %v224_v1 }
  0x22   :  { %134 = vmatpush1.bf16.msra.mxu0 %v196_v11 }
  0x23   :  { %135 = vmatprep.subr.bf16.mxu0 %v224_v1 }
  0x26   :  { %136 = vmatpush1.bf16.msra.mxu0 %v197_v12 }
  0x27   :  { %137 = vmatprep.subr.bf16.mxu0 %v224_v1 }
  0x2a   :  { %138 = vmatpush1.bf16.msra.mxu0 %v198_v13 }
  0x2b   :  { %139 = vmatprep.subr.bf16.mxu0 %v224_v1 }
  0x2e   :  { %140 = vmatpush1.bf16.msra.mxu0 %v199_v14 }
  0x31   :  { %150 = vmatmul.mubr.bf16.vlgmr.msra.gmra.mrb[0].mxu0 %v15_v16 }
 0x104   :  { %v151_v17 = vpop.f32.mrb[0].mxu0 }
 0x105   :  { %158 = vst.msk [vmem:[#allocation2] sm:$0xff] %vm157_vm1, %v151_v17  ;;  %v153_v18 = vpop.f32.mrb[1].mxu0 }
 0x106   :  { %v154_v19 = vpop.f32.mrb[2].mxu0 }
 0x107   :  { %211 = shalt.err (!%p208_p4)
}
 0x108   :  { %s212_s12 = scalar_lea.hbm %s297_s2, 128 }
 0x109   :  { %p213_p5 = scmp.ne.s32.totalorder %s297_s2, %s212_s12  ;;  %p216_p6 = scmp.lt.u32.totalorder %s212_s12, %s297_s2 }
 0x10b   :  { %p218_p7 = pnand %p216_p6, %p213_p5 }
 0x10d   :  { %221 = shalt.err (!%p218_p7)
}
 0x10e   :  { %168 = dma.vmem_to_hbm [thread:$0]  %s166_s10, 128, %s297_s2, [#allocation3]   ;;  %v155_v20 = vpop.f32.mrb[3].mxu0 }
 0x10f   :  { %222 = dma.done.wait [#allocation3], 128  }
 0x110   :  { %223 = vsyncadd [#allocation3], 4294967168 }
 0x111   :  { %172 = vsyncpa [#allocation3], 1 }

</bundles_post_ra>
